<compile_context>
chip_gen: v7x
topology: tpu7x:2x2x1
jax: 0.10.0
libtpu: 0.0.40
codegen_flags: <defaults>
</compile_context>

<pallas_src>
import numpy as np
import jax
import jax.numpy as jnp
from jax.experimental import pallas as pl
from jax.experimental.pallas import tpu as pltpu


# ---------------------------------------------------------------------------
# Deterministic parameter construction (exact replica of the PyTorch init).
# ---------------------------------------------------------------------------
def _get_1d_sincos_pos_embed_from_grid(embed_dim, pos):
    assert embed_dim % 2 == 0
    omega = np.arange(embed_dim // 2, dtype=np.float32)
    omega /= embed_dim / 2.0
    omega = 1.0 / 10000 ** omega
    pos = pos.reshape(-1)
    out = np.einsum("m,d->md", pos, omega)
    emb_sin = np.sin(out)
    emb_cos = np.cos(out)
    return np.concatenate([emb_sin, emb_cos], axis=1)


def _get_2d_sincos_pos_embed_from_grid(embed_dim, grid):
    assert embed_dim % 2 == 0
    emb_h = _get_1d_sincos_pos_embed_from_grid(embed_dim // 2, grid[0])
    emb_w = _get_1d_sincos_pos_embed_from_grid(embed_dim // 2, grid[1])
    return np.concatenate([emb_h, emb_w], axis=1)


def _get_2d_sincos_pos_embed(embed_dim, grid_height, grid_width):
    grid_h = np.arange(grid_height, dtype=np.float32)
    grid_w = np.arange(grid_width, dtype=np.float32)
    grid = np.meshgrid(grid_w, grid_h)          # 'xy' indexing, like PyTorch code
    grid = np.stack(grid, axis=0)
    grid = grid.reshape([2, 1, grid_height, grid_width])
    return _get_2d_sincos_pos_embed_from_grid(embed_dim, grid)   # (H*W, C)


def make_pos_embed_param(grid_height, grid_width, num_features):
    """Returns pos_embed of shape (1, C, H, W), float32 — matches nn.Parameter."""
    pe = _get_2d_sincos_pos_embed(num_features, grid_height, grid_width)   # (H*W, C)
    pe = pe.reshape(grid_height, grid_width, -1).transpose(2, 0, 1)[None]  # (1,C,H,W)
    return jnp.asarray(pe, dtype=jnp.float32)


# ---------------------------------------------------------------------------
# Tiling plan: flatten the C*H*W features of one batch element into a
# lane-dense (rows, lanes) slab and tile the row axis at a ~2 MiB/buffer
# budget.  Prefer an exact factorization (no wrapper pad / slice copies);
# fall back to zero-padding only for ragged feature sizes.
# ---------------------------------------------------------------------------
_MAX_ROWS_PER_TILE = 1024     # 1024 x 512 x 4 B = 2 MiB per f32 buffer per step
_MIN_ROWS_PER_TILE = 128      # keep per-step tiles >= ~256 KiB (amortize step overhead)
_PE_RESIDENT_MAX_BYTES = 4 * 1024 * 1024   # keep the whole pe resident if it is small


def _round_up(a, m):
    return (a + m - 1) // m * m


def _pick_row_tile(rows, batch):
    """Pick rows_per_tile dividing `rows` (multiple of 8 when tiling).
    Returns None if no acceptable divisor exists (caller falls back to padding)."""
    if rows <= _MAX_ROWS_PER_TILE:
        rpt = rows
        # If batch gives no parallelism, split the rows so the grid still has
        # >= 2 "parallel" steps (keeps both v7x TensorCores busy).
        if batch == 1 and rows >= 16 and rows % 16 == 0:
            rpt = rows // 2
        return rpt
    for d in range(_MAX_ROWS_PER_TILE, _MIN_ROWS_PER_TILE - 1, -8):
        if rows % d == 0:
            return d
    return None


def _plan_tiling(n, batch):
    """Return (lanes, rows, rows_per_tile, n_pad); rows * lanes == n_pad >= n
    and rows % rows_per_tile == 0."""
    # Preferred path: a lane width that divides n exactly -> no pad / slice.
    for lanes in (512, 384, 256, 128):
        if n % lanes == 0:
            rows = n // lanes
            rpt = _pick_row_tile(rows, batch)
            if rpt is not None:
                return lanes, rows, rpt, n
    # Fallback (n not a multiple of 128, or pathological row counts): zero-pad
    # the feature axis to a lane-dense rectangle and slice it off afterwards.
    lanes = min(512, _round_up(n, 128))
    rows = pl.cdiv(n, lanes)
    if rows <= _MAX_ROWS_PER_TILE:
        rows = _round_up(rows, 8)          # unmasked sublane stores
        rpt = rows
    else:
        rpt = _MAX_ROWS_PER_TILE
        rows = _round_up(rows, rpt)
    return lanes, rows, rpt, rows * lanes


# ---------------------------------------------------------------------------
# Pallas kernels: elementwise add of the (shared) positional-embedding tile.
# ---------------------------------------------------------------------------
def _add_pos_kernel(x_ref, pe_ref, o_ref):
    # x_ref / pe_ref / o_ref are (rows_per_tile, lanes) tiles
    # (the batch dim of x / o is squeezed away by the BlockSpec).
    o_ref[...] = x_ref[...].astype(o_ref.dtype) + pe_ref[...].astype(o_ref.dtype)


def _add_pos_kernel_resident_pe(x_ref, pe_ref, o_ref):
    # pe_ref holds the *full* (rows, lanes) positional embedding (kept resident
    # in VMEM, fetched once); slice out this grid step's row tile.
    rpt = x_ref.shape[0]
    off = pl.multiple_of(pl.program_id(0) * rpt, 8)
    pe = pe_ref[pl.ds(off, rpt), :]
    o_ref[...] = x_ref[...].astype(o_ref.dtype) + pe.astype(o_ref.dtype)


@jax.jit
def sine_cosine_positional_encoding(x, pos_embed):
    """x: (B, C, H, W); pos_embed: (1, C, H, W).  Returns x + pos_embed."""
    B, C, H, W = x.shape
    n = C * H * W
    # Match PyTorch type promotion (e.g. bf16 x + f32 pos_embed -> f32 result).
    out_dtype = jnp.promote_types(x.dtype, pos_embed.dtype)

    lanes, rows, rows_per_tile, n_pad = _plan_tiling(n, B)
    num_row_tiles = rows // rows_per_tile

    xf = x.reshape(B, n)
    pef = pos_embed.reshape(n)
    if n_pad != n:
        # Ragged fallback only; the common (n % 128 == 0) case never pads.
        xf = jnp.pad(xf, ((0, 0), (0, n_pad - n)))
        pef = jnp.pad(pef, (0, n_pad - n))
    x3 = xf.reshape(B, rows, lanes)        # (B, rows, lanes) lane-dense view
    pe2 = pef.reshape(rows, lanes)         # (rows, lanes) shared across batch

    # In-place add when dtypes allow it (removes the extra HBM output alloc).
    io_aliases = {0: 0} if x3.dtype == out_dtype else {}

    # Keep the full pos-embed resident in VMEM when it is small and there are
    # multiple row tiles (one pe DMA total instead of one per row tile).
    pe_bytes = rows * lanes * pe2.dtype.itemsize
    pe_resident = (pe_bytes <= _PE_RESIDENT_MAX_BYTES) and (num_row_tiles > 1)
    if pe_resident:
        pe_spec = pl.BlockSpec((rows, lanes), lambda t, b: (0, 0))
        kernel = _add_pos_kernel_resident_pe
    else:
        pe_spec = pl.BlockSpec((rows_per_tile, lanes), lambda t, b: (t, 0))
        kernel = _add_pos_kernel

    x_bytes = x3.dtype.itemsize
    o_bytes = jnp.dtype(out_dtype).itemsize
    cost = pl.CostEstimate(
        flops=B * n_pad,
        transcendentals=0,
        bytes_accessed=B * n_pad * (x_bytes + o_bytes) + n_pad * pe2.dtype.itemsize,
    )

    out = pl.pallas_call(
        kernel,
        out_shape=jax.ShapeDtypeStruct((B, rows, lanes), out_dtype),
        grid=(num_row_tiles, B),           # batch innermost: pe block DMA'd once per tile
        in_specs=[
            pl.BlockSpec((pl.Squeezed(), rows_per_tile, lanes),
                         lambda t, b: (b, t, 0)),
            pe_spec,
        ],
        out_specs=pl.BlockSpec((pl.Squeezed(), rows_per_tile, lanes),
                               lambda t, b: (b, t, 0)),
        input_output_aliases=io_aliases,
        cost_estimate=cost,
        compiler_params=pltpu.CompilerParams(
            dimension_semantics=("parallel", "parallel"),
            vmem_limit_bytes=32 * 1024 * 1024),
    )(x3, pe2)

    out = out.reshape(B, n_pad)
    if n_pad != n:
        out = out[:, :n]
    return out.reshape(B, C, H, W)


if __name__ == "__main__":
    key = jax.random.PRNGKey(0)

    # --- main check: shapes consistent with the module (batch=2, channels=4, spatial=16)
    B, C, H, W = 2, 4, 16, 16
    pos_embed = make_pos_embed_param(H, W, C)            # (1, C, H, W)
    x = jax.random.normal(key, (B, C, H, W), dtype=jnp.float32)
    out = jax.block_until_ready(sine_cosine_positional_encoding(x, pos_embed))
    np.testing.assert_allclose(np.asarray(out), np.asarray(x + pos_embed),
                               rtol=1e-6, atol=1e-6)

    # --- batch=1 path (grid-split heuristic) on another divisible shape
    B2, C2, H2, W2 = 1, 8, 16, 16
    pe2 = make_pos_embed_param(H2, W2, C2)
    x2 = jax.random.normal(jax.random.PRNGKey(1), (B2, C2, H2, W2), dtype=jnp.float32)
    out2 = jax.block_until_ready(sine_cosine_positional_encoding(x2, pe2))
    np.testing.assert_allclose(np.asarray(out2), np.asarray(x2 + pe2),
                               rtol=1e-6, atol=1e-6)

    # --- ragged fallback path (C*H*W not a multiple of 128)
    B3, C3, H3, W3 = 2, 4, 10, 10
    pe3 = make_pos_embed_param(H3, W3, C3)
    x3 = jax.random.normal(jax.random.PRNGKey(2), (B3, C3, H3, W3), dtype=jnp.float32)
    out3 = jax.block_until_ready(sine_cosine_positional_encoding(x3, pe3))
    np.testing.assert_allclose(np.asarray(out3), np.asarray(x3 + pe3),
                               rtol=1e-6, atol=1e-6)

    print("KERNEL_OK")
</pallas_src>

<mosaic_0001>
module attributes {stable_mosaic.version = 11 : i64} {
  func.func @_add_pos_kernel(%arg0: i32, %arg1: i32, %arg2: memref<1x2x512xf32, #tpu.memory_space<vmem>>, %arg3: memref<2x512xf32, #tpu.memory_space<vmem>>, %arg4: memref<1x2x512xf32, #tpu.memory_space<vmem>>) attributes {dimension_semantics = [#tpu.dimension_semantics<parallel>, #tpu.dimension_semantics<parallel>], iteration_bounds = array<i64: 1, 2>, scalar_prefetch = 0 : i64, scratch_operands = 0 : i64, tpu.core_type = #tpu.core_type<tc>, window_params = [{transform_indices = @transform_0, window_bounds = array<i64: 1, 2, 512>}, {transform_indices = @transform_1, window_bounds = array<i64: 2, 512>}, {transform_indices = @transform_2, window_bounds = array<i64: 1, 2, 512>}]} {
    %c0 = arith.constant 0 : index
    %c0_0 = arith.constant 0 : index
    %c0_1 = arith.constant 0 : index
    %0 = vector.load %arg2[%c0, %c0_0, %c0_1] : memref<1x2x512xf32, #tpu.memory_space<vmem>>, vector<1x2x512xf32>
    %1 = vector.shape_cast %0 : vector<1x2x512xf32> to vector<2x512xf32>
    %c0_2 = arith.constant 0 : index
    %c0_3 = arith.constant 0 : index
    %2 = vector.load %arg3[%c0_2, %c0_3] : memref<2x512xf32, #tpu.memory_space<vmem>>, vector<2x512xf32>
    %3 = arith.addf %1, %2 : vector<2x512xf32>
    %c0_4 = arith.constant 0 : index
    %c0_5 = arith.constant 0 : index
    %c0_6 = arith.constant 0 : index
    %4 = vector.load %arg4[%c0_4, %c0_5, %c0_6] : memref<1x2x512xf32, #tpu.memory_space<vmem>>, vector<1x2x512xf32>
    %5 = vector.shape_cast %4 : vector<1x2x512xf32> to vector<2x512xf32>
    %6 = vector.shape_cast %3 : vector<2x512xf32> to vector<1x2x512xf32>
    tpu.vector_store %arg4[%c0_4, %c0_5, %c0_6], %6 {strides = array<i32>} : memref<1x2x512xf32, #tpu.memory_space<vmem>>, vector<1x2x512xf32>,
    return
  }
  func.func @transform_0(%arg0: i32, %arg1: i32) -> (i32, i32, i32) {
    %c0_i32 = arith.constant 0 : i32
    %c0_i32_0 = arith.constant 0 : i32
    return %arg1, %arg0, %c0_i32 : i32, i32, i32
  }
  func.func @transform_1(%arg0: i32, %arg1: i32) -> (i32, i32) {
    %c0_i32 = arith.constant 0 : i32
    %c0_i32_0 = arith.constant 0 : i32
    return %arg0, %c0_i32 : i32, i32
  }
  func.func @transform_2(%arg0: i32, %arg1: i32) -> (i32, i32, i32) {
    %c0_i32 = arith.constant 0 : i32
    %c0_i32_0 = arith.constant 0 : i32
    return %arg1, %arg0, %c0_i32 : i32, i32, i32
  }
}

</mosaic_0001>

<bundles_post_ra>
// kernel: sine_cosine_positional_encoding.1
= control target key start
LH: loop header
LB: loop body
LE: loop exit
PB: predicated region body
PF: predicated region fallthrough
CT: control target
= control target key end

     0   :  { %s389_s9 = smov 0   ;;  %s366_s10 = smov 0   ;;  %s403_s0 = inlined_call_operand.vmem [shape: f32[2,2,512], index: 0, kind: input, shape index: {}, may-alias: {0,2}]   ;;  %s404_s1 = inlined_call_operand.vmem [shape: f32[2,512], index: 1, kind: input, shape index: {}]   ;;  %s405_s2 = inlined_call_operand.vmem [shape: f32[2,2,512], index: 2, kind: output, shape index: {}, may-alias: {0,2}]  }
   0x1   :  { %s370_s11 = smov 0  }
   0x2 LB: > { %s21_s12 = sadd.s32 1, %s368_s10  ;;  %p317_p0 = scmp.ge.s32.totalorder %s372_s11, 1  ;;  %s372_s11 = sphi %s370_s11, %s12_s11   ;;  %s368_s10 = sphi %s366_s10, %s367_s10   ;;  %s364_s9 = sphi %s389_s9, %s406_s9  }
   0x3   : > { %p22_p1 = scmp.ge.s32.totalorder %s21_s12, 2  ;;  %p142_p2 = scmp.lt.s32.totalorder %s372_s11, 3 }
   0x5   : > { %s408_s12 = smov (%p22_p1, %s21_s12), 0  ;;  %p143_p3 = pnand %p317_p0, %p142_p2 }
   0x6   : > { %p177_p4 = scmp.lt.s32.totalorder (!%p143_p3), %s364_s9, 1  ;;  %v201_v0 = vld [vmem:[%s404_s1] sm:$0xff] (!%p143_p3) }
   0x7   : > { %146 = sbr.rel (%p143_p3) target bundleno = 21 (0x15), region = 28 }
   0xe   : > { %s410_s9 = smov (!%p177_p4, %s364_s9), 1 }
   0xf   : > { %s324_s13 = sshll.u32 %s410_s9, 3 }
  0x10   : > { %s185_s18 = scalar_lea.vmem %s403_s0, %s324_s13  ;;  %s199_s21 = scalar_lea.vmem %s405_s2, %s324_s13 }
  0x11   : > { %v200_v1 = vld [vmem:[%s185_s18] sm:$0xff] }
  0x12   : > { %v202_v2 = vadd.f32 %v201_v0, %v200_v1 }
  0x14   : > { %203 = vst [vmem:[%s199_s21] sm:$0xff] %v202_v2 }
  0x15 PF: > { %s12_s11 = sadd.s32 1, %s372_s11   ;;  %s406_s9 = smov %s368_s10 }
  0x16   : > { %p9_p5 = scmp.ge.s32.totalorder %s12_s11, 4   ;;  %s367_s10 = smov %s408_s12  }
  0x18   :  { %11 = sbr.rel (!%p9_p5) target bundleno = 2 (0x2), region = 61 }

</bundles_post_ra>
